<compile_context>
chip_gen: v7x
topology: tpu7x:2x2x1
jax: 0.10.0
libtpu: 0.0.40
codegen_flags: <defaults>
</compile_context>

<pallas_src>
import numpy as np
import jax
import jax.numpy as jnp
from jax.experimental import pallas as pl
from jax.experimental.pallas import tpu as pltpu


# ----------------------------------------------------------------------------
# Parameter / buffer construction (glue, plain numpy — mirrors __init__)
# ----------------------------------------------------------------------------
def gram_schmidt_np(vecs: np.ndarray) -> np.ndarray:
    """Gram-Schmidt over rows of a (n, d) matrix, matching the torch reference."""
    out = []
    for v in vecs:
        v = v.astype(np.float64).copy()
        for u in out:
            v = v - (np.dot(u, v) / np.dot(u, u)) * u
        v = v / np.linalg.norm(v)
        out.append(v)
    return np.stack(out)


def initialize_orthogonal_filters_np(c: int, h: int, w: int, rng) -> np.ndarray:
    """Returns (c, h, w) orthonormal filters, matching initialize_orthogonal_filters."""
    if h * w < c:
        n = c // (h * w)
        grams = [gram_schmidt_np(rng.random((h * w, h * w))) for _ in range(n)]
        flat = np.concatenate(grams, axis=0)
    else:
        flat = gram_schmidt_np(rng.random((c, h * w)))
    return flat.reshape(c, h, w).astype(np.float32)


# ----------------------------------------------------------------------------
# Pallas kernel (hot path) — one batch tile of TB samples per grid step
# ----------------------------------------------------------------------------
def oca_kernel(x_ref, f_ref, w1t_ref, w2t_ref, o_ref):
    # x_ref/o_ref: (TB, C, HW) ; f_ref: (C, HW) ; w1t_ref: (C, Cr) ; w2t_ref: (Cr, C)
    x = x_ref[...]
    if x.dtype != jnp.float32:           # no-op (trace-time branch) for f32 inputs
        x = x.astype(jnp.float32)

    # GramSchmidtTransform: per-channel spatial reduction of filter * x.
    z = jnp.sum(x * f_ref[...], axis=-1)                                   # (TB, C)

    # channel_attention MLP, batched over the TB samples of this block (MXU).
    h = jnp.dot(z, w1t_ref[...], preferred_element_type=jnp.float32)       # (TB, Cr)
    h = jnp.maximum(h, 0.0)
    e = jnp.dot(h, w2t_ref[...], preferred_element_type=jnp.float32)       # (TB, C)
    e = jax.nn.sigmoid(e)

    # channel excitation, broadcast over the spatial (lane) axis.
    o_ref[...] = (x * e[:, :, None]).astype(o_ref.dtype)


# ----------------------------------------------------------------------------
# Wrapper
# ----------------------------------------------------------------------------
def orthogonal_channel_attention(x, filt, w1, w2, height, *,
                                 pipe_budget_bytes=32 * 1024 * 1024):
    """x: (B, C, H, W) NCHW. filt: (C, height, height). w1: (C//16, C). w2: (C, C//16).

    Returns x_pooled * excitation with shape (B, C, height, height) — identical to the
    torch module, which reassigns x to the pooled tensor before the multiply.
    """
    B, C, H, W = x.shape
    if H != height or W != height:
        # adaptive_avg_pool2d — only the exactly-divisible case is implemented here.
        # TODO(synk): general adaptive_avg_pool2d with uneven bins is not implemented;
        #             fusing this pooling into the kernel (avoid one HBM round-trip)
        #             is a further optimization left for the H != height path.
        assert H % height == 0 and W % height == 0
        x = x.reshape(B, C, height, H // height, height, W // height).mean(axis=(3, 5))
        H = W = height

    HW = H * W
    xf = x.reshape(B, C, HW)                              # free reshape (contiguous)
    ff = jnp.asarray(filt, jnp.float32).reshape(C, HW)
    w1t = jnp.asarray(w1, jnp.float32).T                  # (C, Cr)  (transposed once)
    w2t = jnp.asarray(w2, jnp.float32).T                  # (Cr, C)
    Cr = w1t.shape[1]

    # ---- batch-tile selection (VMEM-budget driven) --------------------------
    itemsize = jnp.dtype(x.dtype).itemsize
    bytes_per_sample = C * HW * itemsize
    # x-in and out blocks are each double-buffered by the pipeline: 4 block copies.
    TB = max(1, int(pipe_budget_bytes // (4 * bytes_per_sample)))
    TB = min(TB, B)
    if B >= 2:
        # keep >= 2 grid steps so v7x's 2 TensorCores both get work on the
        # "parallel" batch axis (near-zero cost on single-TC v5e/v6e).
        TB = min(TB, (B + 1) // 2)
    grid = (pl.cdiv(B, TB),)

    # scoped-VMEM request: blocks + resident constants + slack, capped for v7x (64 MiB).
    const_bytes = int(ff.size + w1t.size + w2t.size) * 4
    est_vmem = 4 * TB * bytes_per_sample + 2 * const_bytes + (2 << 20)
    vmem_limit = int(min(48 << 20, max(est_vmem, 24 << 20)))

    out = pl.pallas_call(
        oca_kernel,
        out_shape=jax.ShapeDtypeStruct((B, C, HW), x.dtype),
        grid_spec=pltpu.PrefetchScalarGridSpec(
            num_scalar_prefetch=0,
            grid=grid,
            in_specs=[
                pl.BlockSpec((TB, C, HW), lambda b: (b, 0, 0)),   # x   (batch tile)
                # constant index_maps -> fetched once, VMEM-resident across steps
                pl.BlockSpec((C, HW), lambda b: (0, 0)),          # orthogonal filters
                pl.BlockSpec((C, Cr), lambda b: (0, 0)),          # W1^T
                pl.BlockSpec((Cr, C), lambda b: (0, 0)),          # W2^T
            ],
            out_specs=pl.BlockSpec((TB, C, HW), lambda b: (b, 0, 0)),
        ),
        compiler_params=pltpu.CompilerParams(
            dimension_semantics=("parallel",),
            vmem_limit_bytes=vmem_limit,
        ),
    )(xf, ff, w1t, w2t)

    return out.reshape(B, C, H, W)


# ----------------------------------------------------------------------------
# Demo / correctness check
# ----------------------------------------------------------------------------
if __name__ == "__main__":
    B, C, Hh = 2, 32, 8          # channels must be >= 16 (C // 16 hidden units)
    Cr = C // 16

    key = jax.random.PRNGKey(0)
    kx, k1, k2 = jax.random.split(key, 3)

    x = jax.random.normal(kx, (B, C, Hh, Hh), dtype=jnp.float32)

    # constant_filter buffer (deterministic, built like the torch module's __init__)
    rng = np.random.default_rng(0)
    filt = jnp.asarray(initialize_orthogonal_filters_np(C, Hh, Hh, rng))

    # nn.Linear default init: U(-1/sqrt(fan_in), 1/sqrt(fan_in)), bias=False
    w1 = jax.random.uniform(k1, (Cr, C), minval=-1.0 / np.sqrt(C),
                            maxval=1.0 / np.sqrt(C), dtype=jnp.float32)
    w2 = jax.random.uniform(k2, (C, Cr), minval=-1.0 / np.sqrt(Cr),
                            maxval=1.0 / np.sqrt(Cr), dtype=jnp.float32)

    out = orthogonal_channel_attention(x, filt, w1, w2, Hh)
    out = jax.block_until_ready(out)

    # pure-JAX reference of the same forward pass
    z_ref = jnp.sum(filt[None] * x, axis=(-1, -2))                       # (B, C)
    e_ref = jax.nn.sigmoid(jnp.maximum(z_ref @ w1.T, 0.0) @ w2.T)        # (B, C)
    ref = x * e_ref[:, :, None, None]
    assert out.shape == (B, C, Hh, Hh)
    assert jnp.allclose(out, ref, atol=1e-5, rtol=1e-5)

    print("KERNEL_OK")
</pallas_src>

<mosaic_0001>
module attributes {stable_mosaic.version = 11 : i64} {
  func.func @oca_kernel(%arg0: i32, %arg1: memref<1x32x64xf32, #tpu.memory_space<vmem>>, %arg2: memref<32x64xf32, #tpu.memory_space<vmem>>, %arg3: memref<32x2xf32, #tpu.memory_space<vmem>>, %arg4: memref<2x32xf32, #tpu.memory_space<vmem>>, %arg5: memref<1x32x64xf32, #tpu.memory_space<vmem>>) attributes {dimension_semantics = [#tpu.dimension_semantics<parallel>], iteration_bounds = array<i64: 2>, scalar_prefetch = 0 : i64, scratch_operands = 0 : i64, tpu.core_type = #tpu.core_type<tc>, window_params = [{transform_indices = @transform_0, window_bounds = array<i64: 1, 32, 64>}, {pipeline_mode = #tpu.pipeline_mode<synchronous>, transform_indices = @transform_1, window_bounds = array<i64: 32, 64>}, {pipeline_mode = #tpu.pipeline_mode<synchronous>, transform_indices = @transform_2, window_bounds = array<i64: 32, 2>}, {pipeline_mode = #tpu.pipeline_mode<synchronous>, transform_indices = @transform_3, window_bounds = array<i64: 2, 32>}, {transform_indices = @transform_4, window_bounds = array<i64: 1, 32, 64>}]} {
    %c0 = arith.constant 0 : index
    %c0_0 = arith.constant 0 : index
    %c0_1 = arith.constant 0 : index
    %0 = vector.load %arg1[%c0, %c0_0, %c0_1] : memref<1x32x64xf32, #tpu.memory_space<vmem>>, vector<1x32x64xf32>
    %c0_2 = arith.constant 0 : index
    %c0_3 = arith.constant 0 : index
    %1 = vector.load %arg2[%c0_2, %c0_3] : memref<32x64xf32, #tpu.memory_space<vmem>>, vector<32x64xf32>
    %2 = vector.shape_cast %1 : vector<32x64xf32> to vector<1x32x64xf32>
    %3 = arith.mulf %0, %2 : vector<1x32x64xf32>
    %cst = arith.constant dense<0.000000e+00> : vector<1x32xf32>
    %4 = vector.multi_reduction <add>, %3, %cst [2] : vector<1x32x64xf32> to vector<1x32xf32>
    %c0_4 = arith.constant 0 : index
    %c0_5 = arith.constant 0 : index
    %5 = vector.load %arg3[%c0_4, %c0_5] : memref<32x2xf32, #tpu.memory_space<vmem>>, vector<32x2xf32>
    %cst_6 = arith.constant dense<0.000000e+00> : vector<1x2xf32>
    %6 = tpu.matmul %4, %5, %cst_6 {dimension_numbers = #tpu.dot_dimension_numbers<[1], [0], [0], [1], [0, 0, 1, 1], [], []>} : vector<1x32xf32>, vector<32x2xf32>, vector<1x2xf32> -> vector<1x2xf32>
    %cst_7 = arith.constant 0.000000e+00 : f32
    %7 = vector.broadcast %cst_7 : f32 to vector<1x2xf32>
    %8 = arith.maximumf %6, %7 : vector<1x2xf32>
    %c0_8 = arith.constant 0 : index
    %c0_9 = arith.constant 0 : index
    %9 = vector.load %arg4[%c0_8, %c0_9] : memref<2x32xf32, #tpu.memory_space<vmem>>, vector<2x32xf32>
    %cst_10 = arith.constant dense<0.000000e+00> : vector<1x32xf32>
    %10 = tpu.matmul %8, %9, %cst_10 {dimension_numbers = #tpu.dot_dimension_numbers<[1], [0], [0], [1], [0, 0, 1, 1], [], []>} : vector<1x2xf32>, vector<2x32xf32>, vector<1x32xf32> -> vector<1x32xf32>
    %11 = arith.negf %10 : vector<1x32xf32>
    %12 = math.exp %11 : vector<1x32xf32>
    %cst_11 = arith.constant 1.000000e+00 : f32
    %13 = vector.broadcast %cst_11 : f32 to vector<1x32xf32>
    %14 = arith.addf %13, %12 : vector<1x32xf32>
    %15 = arith.divf %13, %14 : vector<1x32xf32>
    %16 = vector.shape_cast %15 : vector<1x32xf32> to vector<1x32x1xf32>
    %17 = vector.broadcast %16 : vector<1x32x1xf32> to vector<1x32x64xf32>
    %18 = arith.mulf %0, %17 : vector<1x32x64xf32>
    %c0_12 = arith.constant 0 : index
    %c0_13 = arith.constant 0 : index
    %c0_14 = arith.constant 0 : index
    %19 = vector.load %arg5[%c0_12, %c0_13, %c0_14] : memref<1x32x64xf32, #tpu.memory_space<vmem>>, vector<1x32x64xf32>
    tpu.vector_store %arg5[%c0_12, %c0_13, %c0_14], %18 {strides = array<i32>} : memref<1x32x64xf32, #tpu.memory_space<vmem>>, vector<1x32x64xf32>,
    return
  }
  func.func @transform_0(%arg0: i32) -> (i32, i32, i32) {
    %c0_i32 = arith.constant 0 : i32
    %c0_i32_0 = arith.constant 0 : i32
    %c0_i32_1 = arith.constant 0 : i32
    return %arg0, %c0_i32, %c0_i32_0 : i32, i32, i32
  }
  func.func @transform_1(%arg0: i32) -> (i32, i32) {
    %c0_i32 = arith.constant 0 : i32
    %c0_i32_0 = arith.constant 0 : i32
    %c0_i32_1 = arith.constant 0 : i32
    return %c0_i32, %c0_i32_0 : i32, i32
  }
  func.func @transform_2(%arg0: i32) -> (i32, i32) {
    %c0_i32 = arith.constant 0 : i32
    %c0_i32_0 = arith.constant 0 : i32
    %c0_i32_1 = arith.constant 0 : i32
    return %c0_i32, %c0_i32_0 : i32, i32
  }
  func.func @transform_3(%arg0: i32) -> (i32, i32) {
    %c0_i32 = arith.constant 0 : i32
    %c0_i32_0 = arith.constant 0 : i32
    %c0_i32_1 = arith.constant 0 : i32
    return %c0_i32, %c0_i32_0 : i32, i32
  }
  func.func @transform_4(%arg0: i32) -> (i32, i32, i32) {
    %c0_i32 = arith.constant 0 : i32
    %c0_i32_0 = arith.constant 0 : i32
    %c0_i32_1 = arith.constant 0 : i32
    return %arg0, %c0_i32, %c0_i32_0 : i32, i32, i32
  }
}

</mosaic_0001>

<bundles_post_ra>
// kernel: tpu_custom_call.1
= control target key start
LH: loop header
LB: loop body
LE: loop exit
PB: predicated region body
PF: predicated region fallthrough
CT: control target
= control target key end

     0   :  { %9 = vsyncpa [#allocation3], 0  ;;  %s1004_s0 = inlined_call_operand.hbm [shape: f32[2,32,64], index: 0, kind: input, shape index: {}]   ;;  %s1005_s1 = inlined_call_operand.vmem [shape: f32[32,64], index: 1, kind: input, shape index: {}]   ;;  %s1006_s2 = inlined_call_operand.vmem [shape: f32[32,2], index: 2, kind: input, shape index: {}]   ;;  %s1007_s3 = inlined_call_operand.vmem [shape: f32[2,32], index: 3, kind: input, shape index: {}]   ;;  %s1008_s4 = inlined_call_operand.hbm [shape: f32[2,32,64], index: 4, kind: output, shape index: {}]  }
   0x1   :  { %11 = vsyncpa [#allocation3 + $0x1], 0 }
   0x2   :  { %12 = vsyncpa [#allocation4], 0 }
   0x3   :  { %14 = vsyncpa [#allocation4 + $0x1], 0  ;;  %s787_s15 = smov 0   ;;  %s789_s16 = smov 0  }
   0x4   :  { %s791_s17 = smov 0   ;;  %s793_s18 = smov 0  }
   0x5 LB: > { %s808_s19 = sadd.s32 4294967295, %s751_s18   ;;  %s549_s20 = sadd.s32 4294967294, %s751_s18   ;;  %s751_s18 = sphi %s793_s18, %s1021_s18   ;;  %s747_s17 = sphi %s791_s17, %s1020_s17   ;;  %s743_s16 = sphi %s789_s16, %s1019_s16   ;;  %s739_s15 = sphi %s787_s15, %s1018_s15  }
   0x6   : > { %s812_s21 = sadd.s32 1, %s751_s18   ;;  %s27_s22 = sadd.s32 1, %s747_s17 }
   0x7   : > { %s24_s23 = ssub.s32 %s751_s18, %s812_s21  ;;  %p34_p0 = scmp.ne.s32.totalorder %s747_s17, %s743_s16 }
   0x8   : > { %p25_p1 = scmp.eq.s32.totalorder %s24_s23, 0  ;;  %p35_p2 = scmp.eq.s32.totalorder %s751_s18, 0 }
   0x9   : > { %p40_p3 = scmp.ne.s32.totalorder %s743_s16, %s739_s15  ;;  %p41_p4 = scmp.eq.s32.totalorder %s808_s19, 0 }
   0xa   : > { %s824_s24 = scalar_select %p25_p1, %s747_s17, %s27_s22  }
   0xb   : > { %p826_p5 = por %p35_p2, %p34_p0  ;;  %p830_p6 = por %p41_p4, %p40_p3 }
   0xc   : > { %p127_p7 = scmp.eq.s32.totalorder %s808_s19, 1  ;;  %p133_p8 = scmp.eq.s32.totalorder %s549_s20, 1 }
   0xd   : > { %p610_p10 = scmp.lt.s32.totalorder %s751_s18, 2  ;;  %s162_s29 = sand.u32 1, %s747_s17  }
   0xe   : > { %p837_p11 = por %p127_p7, %p34_p0  ;;  %p841_p12 = por %p133_p8, %p40_p3 }
   0xf   : > { %s567_s30 = sshll.u32 %s751_s18, 9  ;;  %s552_s5 = sshll.u32 %s162_s29, 5 }
  0x10   : > { %s1012_s27 = scalar_select %p837_p11, 1, 0 }
  0x11   : > { %s1013_s28 = scalar_select %p841_p12, 1, 0 }
  0x12   : > { %s850_s8 = scalar_lea.hbm %s1004_s0, %s567_s30  ;;  %s166_s9 = scalar_lea.vmem [#allocation2], %s552_s5 }
  0x13   : > { %s173_s10 = sshll.u32 %s166_s9, 4  ;;  %p854_p13 = pnand %p610_p10, %p826_p5  ;;  %s858_s10 = int_to_ptr.vmem [resolvable:$true] %s173_s10 }
  0x14   : > { %s860_s12 = scalar_lea.sflag [#allocation3], %s162_s29  ;;  %s655_s13 = scalar_lea.hbm %s850_s8, 512 }
  0x15   : > { %p656_p0 = scmp.ne.s32.totalorder %s850_s8, %s655_s13  ;;  %p657_p1 = pneg %p854_p13 }
  0x16   : > { %s660_s22 = scalar_lea.hbm %s1004_s0, 1024  ;;  %p661_p4 = scmp.lt.u32.totalorder %s850_s8, %s1004_s0 }
  0x17   : > { %p658_p2 = pnand %p657_p1, %p656_p0  ;;  %p662_p5 = scmp.lt.u32.totalorder %s660_s22, %s655_s13 }
  0x18   : > { %p664_p8 = scmp.lt.u32.totalorder %s655_s13, %s850_s8 }
  0x19   : > { %p659_p3 = pneg %p658_p2  ;;  %p663_p7 = por %p662_p5, %p661_p4 }
  0x1b   : > { %p665_p10 = por %p664_p8, %p663_p7 }
  0x1d   : > { %p666_p9 = pnand %p665_p10, %p659_p3 }
  0x1f   : > { %669 = shalt.err (!%p666_p9)
}
  0x20   : > { %s670_s29 = scalar_lea.vmem %s858_s10, 512  ;;  %s753_s30 = smov [#allocation2]  }
  0x21   : > { %p671_p0 = scmp.ne.s32.totalorder %s858_s10, %s670_s29  ;;  %s675_s5 = sshll.u32 %s753_s30, 4  ;;  %s676_s5 = int_to_ptr.vmem [resolvable:$false] %s675_s5 }
  0x22   : > { %s677_s6 = scalar_lea.vmem %s676_s5, 1024  ;;  %p678_p11 = scmp.lt.s32.totalorder %s858_s10, %s676_s5 }
  0x23   : > { %p673_p2 = pnand %p671_p0, %p657_p1  ;;  %p679_p4 = scmp.lt.s32.totalorder %s677_s6, %s670_s29 }
  0x25   : > { %p674_p12 = pneg %p673_p2  ;;  %p680_p5 = por %p679_p4, %p678_p11 }
  0x27   : > { %p681_p7 = pnand %p680_p5, %p674_p12 }
  0x29   : > { %684 = shalt.err (!%p681_p7)
}
  0x2a   : > { %s754_s7 = smov 128   ;;  %s755_s9 = smov 8  }
  0x2b   : > { %605 = dma.hbm_to_vmem [thread:$0]  (!%p854_p13), %s850_s8, 512, %s858_s10, %s860_s12, %s754_s7, %s754_s7, %s755_s9  }
  0x2c   : > { %p555_p9 = scmp.ge.s32.totalorder %s751_s18, 1  ;;  %p181_p1 = scmp.lt.s32.totalorder %s751_s18, 3 }
  0x2e   : > { %p182_p3 = pnand %p555_p9, %p181_p1 }
  0x2f   : > { %s891_s13 = sand.u32 (!%p182_p3), 1, %s743_s16  }
  0x30   : > { %185 = sbr.rel (%p182_p3) target bundleno = 806 (0x326), region = 36  ;;  %s556_s14 = sshll.u32 (!%p182_p3), %s891_s13, 5 }
  0x31   : > { %s188_s20 = scalar_lea.sflag (!%p182_p3), [#allocation3], %s891_s13  ;;  %s191_s22 = scalar_lea.vmem (!%p182_p3), [#allocation2], %s556_s14 }
  0x37   : > { %730 = dma.done.wait (%p830_p6), %s188_s20, 512  }
  0x38   : > { %732 = vsyncadd (%p830_p6), %s188_s20, 4294966784  ;;  %v901_v0 = vld [vmem:[%s191_s22] sm:$0xff]  ;;  %vm228_vm0 = vcmask 523264   ;;  %v906_v2 = vld [vmem:[%s191_s22 + $0x10] sm:$0xff]  ;;  %v756_v19 = vmov 0.0|0.0   ;;  %vm757_vm1 = vmmov 0   ;;  %v249_v24 = vlaneseq }
  0x39   : > { %v220_v1 = vld [vmem:[%s1005_s1] sm:$0xff]  ;;  %v222_v4 = vld [vmem:[%s1005_s1 + $0x10] sm:$0xff]  ;;  %v912_v5 = vld [vmem:[%s191_s22 + $0x8] sm:$0xff]  ;;  %592 = vmatprep.subr.bf16.mxu0 %v756_v19  ;;  %v758_v23 = vmov 0.0   ;;  %vm260_vm2 = vcmask 130112   ;;  %vm267_vm3 = vcmask 195712  }
  0x3a   : > { %v224_v3 = vmul.f32 %v220_v1, %v901_v0  ;;  %v221_v6 = vld [vmem:[%s1005_s1 + $0x8] sm:$0xff]  ;;  %v226_v7 = vmul.f32 %v222_v4, %v906_v2  ;;  %v919_v9 = vld [vmem:[%s191_s22 + $0x18] sm:$0xff]  ;;  %v241_v16 = vld [vmem:[%s1006_s2] sm:$0xff]  ;;  %584 = vmatprep.mubr.msk.f32.mxu0 %vm757_vm1, %v758_v23  ;;  %587 = vmatprep.subr.mxu1 %v758_v23  ;;  %v250_v25 = vand.u32 127, %v249_v24  ;;  %v252_v26 = vshrl.u32 %v249_v24, 7  ;;  %s215_s12 = scalar_lea.vmem [#allocation5], %s556_s14 }
  0x3b   : > { %v225_v8 = vmul.f32 %v221_v6, %v912_v5  ;;  %v223_v10 = vld [vmem:[%s1005_s1 + $0x18] sm:$0xff]  ;;  %v242_v17 = vld [vmem:[%s1006_s2 + $0x8] sm:$0xff]  ;;  %v243_v20 = vld [vmem:[%s1006_s2 + $0x10] sm:$0xff]  ;;  %589 = vmatprep.mubr.msk.f32.mxu1 %vm757_vm1, %v758_v23  ;;  %vm274_vm4 = vcmask 261312   ;;  %vm276_vm5 = vcmask 261120   ;;  %vm355_vm6 = vcmask 1041408  }
  0x3c   : > { %v229_v11 = vsel %vm228_vm0, %v224_v3, 0.0  ;;  %v227_v12 = vmul.f32 %v223_v10, %v919_v9  ;;  %v235_v13 = vsel %vm228_vm0, %v226_v7, 0.0  ;;  %v593_v18 = vpack.c.bf16 %v242_v17, %v241_v16  ;;  %v244_v21 = vld [vmem:[%s1006_s2 + $0x18] sm:$0xff]  ;;  %v350_v45 = vld [vmem:[%s1007_s3] sm:$0x3]  ;;  %s476_s23 = sshll.u32 %s215_s12, 4  ;;  %s952_s23 = int_to_ptr.vmem [resolvable:$true] %s476_s23 }
  0x3d   : > { %230 = vadd.xlane.f32.xlu0 %v229_v11  ;;  %236 = vadd.xlane.f32.xlu1 %v235_v13  ;;  %v232_v14 = vsel %vm228_vm0, %v225_v8, 0.0  ;;  %v596_v22 = vpack.c.bf16 %v244_v21, %v243_v20  ;;  %v255_v27 = vadd.s32 4294967288, %v250_v25  ;;  %v262_v28 = vadd.s32 4294967280, %v250_v25  ;;  %s568_s26 = sshll.u32 %s808_s19, 9  ;;  %s463_s30 = scalar_lea.sflag [#allocation4], %s891_s13 }
  0x3e   : > { %v238_v15 = vsel %vm228_vm0, %v227_v12, 0.0  ;;  %594 = vmatpush3.bf16.msra.mxu0 %v593_v18  ;;  %v269_v29 = vadd.s32 4294967272, %v250_v25  ;;  %v253_v31 = vsub.s32 %v250_v25, %v252_v26  ;;  %588 = vmatpush3.msk.msra.mxu1 %vm355_vm6, %v350_v45  ;;  %vm351_vm7 = vcmask 15360   ;;  %s958_s29 = scalar_lea.hbm %s1008_s4, %s568_s26  ;;  %s685_s5 = scalar_lea.vmem %s952_s23, 512 }
  0x3f   : > { %595 = vmatprep.subr.bf16.mxu0 %v756_v19  ;;  %v258_v33 = vsub.s32 %v255_v27, %v252_v26  ;;  %v265_v34 = vsub.s32 %v262_v28, %v252_v26  ;;  %v437_v54 = vsub.s32 0, %v252_v26  ;;  %p686_p6 = scmp.ne.s32.totalorder %s952_s23, %s685_s5  ;;  %p1015_p11 = scmp.ne.s32.totalorder %s1012_s27, 0 }
  0x40   : > { %v272_v35 = vsub.s32 %v269_v29, %v252_v26  ;;  %s759_s19 = smov [#allocation5]  }
  0x41   : > { %233 = vadd.xlane.f32.xlu0 %v232_v14  ;;  %239 = vadd.xlane.f32.xlu1 %v238_v15  ;;  %p687_p12 = pnand %p686_p6, %p1015_p11  ;;  %s689_s6 = sshll.u32 %s759_s19, 4  ;;  %s690_s6 = int_to_ptr.vmem [resolvable:$false] %s689_s6 }
  0x42   : > { %597 = vmatpush3.bf16.msra.mxu0 %v596_v22  ;;  %s691_s7 = scalar_lea.vmem %s690_s6, 1024  ;;  %p692_p8 = scmp.lt.s32.totalorder %s952_s23, %s690_s6 }
  0x43   : > { %p688_p13 = pneg %p687_p12  ;;  %p693_p10 = scmp.lt.s32.totalorder %s691_s7, %s685_s5 }
  0x45   : > { %p694_p0 = por %p693_p10, %p692_p8 }
  0x47   : > { %p695_p2 = pnand %p694_p0, %p688_p13 }
  0xca   : > { %v231_v30 = vpop.xlane.xlu0 %230  ;;  %v237_v32 = vpop.xlane.xlu1 %236 }
  0xcb   : > { %v254_v37 = vrot.slane %v231_v30, %v253_v31  ;;  %v266_v40 = vrot.slane %v237_v32, %v265_v34 }
  0xce   : > { %v234_v36 = vpop.xlane.xlu0 %233  ;;  %v240_v39 = vpop.xlane.xlu1 %239 }
  0xcf   : > { %v259_v38 = vrot.slane %v234_v36, %v258_v33  ;;  %v273_v41 = vrot.slane %v240_v39, %v272_v35 }
  0xd1   : > { %v261_v42 = vsel %vm260_vm2, %v259_v38, %v254_v37 }
  0xd2   : > { %v268_v43 = vsel %vm267_vm3, %v266_v40, %v261_v42 }
  0xd3   : > { %v275_v44 = vsel %vm274_vm4, %v273_v41, %v268_v43 }
  0xd4   : > { %585 = vmatmul.mubr.msk.f32.vlgmr.msra.gmra.mrb[0].mxu0 %vm276_vm5, %v275_v44 }
 0x1a7   : > { %v345_v46 = vpop.f32.mrb[0].mxu0 }
 0x1a8   : > { %v349_v47 = vmax.f32 %v345_v46, 0.0  ;;  %v586_v48 = vpop.f32.mrb[1].mxu0 }
 0x1aa   : > { %590 = vmatmul.mubr.msk.f32.vlgmr.msra.gmra.mrb[0].mxu1 %vm351_vm7, %v349_v47 }
 0x27d   : > { %v425_v49 = vpop.f32.mrb[0].mxu1 }
 0x27e   : > { %v561_v50 = vmul.f32 -1.442695, %v425_v49  ;;  %v591_v51 = vpop.f32.mrb[1].mxu1 }
 0x280   : > { %651 = vpow2.f32 %v561_v50 }
 0x28a   : > { %v652_v52 = vpop.eup %651 }
 0x28b   : > { %v432_v53 = vadd.f32 1.0, %v652_v52 }
 0x28d   : > { %653 = vrcp.f32 %v432_v53 }
 0x297   : > { %v654_v55 = vpop.eup %653 }
 0x298   : > { %v438_v56 = vrot.slane %v654_v55, %v437_v54 }
 0x29a   : > { %444 = vbcast.lane.b32.xlu1 %v438_v56, 264  ;;  %440 = vbcast.lane.b32.xlu0 %v438_v56, 256 }
 0x29e   : > { %448 = vbcast.lane.b32.xlu1 %v438_v56, 272 }
 0x2a2   : > { %452 = vbcast.lane.b32.xlu1 %v438_v56, 280 }
 0x30c   : > { %v445_v57 = vpop.permute.xlu1 %444  ;;  %v441_v58 = vpop.permute.xlu0 %440 }
 0x30d   : > { %v455_v59 = vmul.f32 %v445_v57, %v912_v5  ;;  %v454_v60 = vmul.f32 %v441_v58, %v901_v0 }
 0x30f   : > { %459 = vst.msk [vmem:[%s215_s12 + $0x8] sm:$0xff] %vm228_vm0, %v455_v59  ;;  %458 = vst.msk [vmem:[%s215_s12] sm:$0xff] %vm228_vm0, %v454_v60 }
 0x310   : > { %v449_v61 = vpop.permute.xlu1 %448 }
 0x311   : > { %v456_v62 = vmul.f32 %v449_v61, %v906_v2 }
 0x313   : > { %460 = vst.msk [vmem:[%s215_s12 + $0x10] sm:$0xff] %vm228_vm0, %v456_v62 }
 0x314   : > { %v453_v63 = vpop.permute.xlu1 %452 }
 0x315   : > { %v457_v0 = vmul.f32 %v453_v63, %v919_v9 }
 0x317   : > { %461 = vst.msk [vmem:[%s215_s12 + $0x18] sm:$0xff] %vm228_vm0, %v457_v0 }
 0x318   : > { %698 = shalt.err (!%p695_p2)
}
 0x319   : > { %s699_s9 = scalar_lea.hbm %s958_s29, 512  ;;  %s703_s8 = scalar_lea.hbm %s1008_s4, 1024 }
 0x31a   : > { %p700_p4 = scmp.ne.s32.totalorder %s958_s29, %s699_s9  ;;  %p704_p9 = scmp.lt.u32.totalorder %s958_s29, %s1008_s4 }
 0x31b   : > { %p705_p1 = scmp.lt.u32.totalorder %s703_s8, %s699_s9  ;;  %p707_p6 = scmp.lt.u32.totalorder %s699_s9, %s958_s29 }
 0x31c   : > { %p701_p5 = pnand %p700_p4, %p1015_p11 }
 0x31d   : > { %p706_p3 = por %p705_p1, %p704_p9 }
 0x31e   : > { %p702_p7 = pneg %p701_p5 }
 0x31f   : > { %p708_p12 = por %p707_p6, %p706_p3 }
 0x321   : > { %p709_p13 = pnand %p708_p12, %p702_p7 }
 0x323   : > { %712 = shalt.err (!%p709_p13)
}
 0x324   : > { %s760_s12 = smov 128   ;;  %s761_s26 = smov 8  }
 0x325   : > { %600 = dma.vmem_to_hbm [thread:$0]  (%p1015_p11), %s952_s23, 512, %s958_s29, %s463_s30, %s760_s12, %s760_s12, %s761_s26  }
 0x326 PF: > { %s491_s25 = sand.u32 1, %s739_s15   ;;  %p1016_p8 = scmp.ne.s32.totalorder %s1013_s28, 0 }
 0x327   : > { %p1017_p10 = scmp.ge.s32.totalorder %s751_s18, 2  ;;  %s492_s14 = scalar_lea.sflag [#allocation4], %s491_s25 }
 0x329   : > { %p607_p0 = pnand %p1017_p10, %p1016_p8 }
 0x32b   : > { %734 = dma.done.wait (!%p607_p0), %s492_s14, 512  }
 0x32c   : > { %736 = vsyncadd (!%p607_p0), %s492_s14, 4294966784  ;;  %p17_p2 = scmp.ge.s32.totalorder %s812_s21, 4   ;;  %s1018_s15 = smov %s743_s16 }
 0x32d   : > { %s1019_s16 = smov %s747_s17  ;;  %s1020_s17 = smov %s824_s24 }
 0x32e   : > { %s1021_s18 = smov %s812_s21  ;;  %19 = sbr.rel (!%p17_p2) target bundleno = 5 (0x5), region = 81 }
 0x335   :  { %497 = vsyncpa [#allocation3], 1 }
 0x336   :  { %499 = vsyncpa [#allocation3 + $0x1], 1 }
 0x337   :  { %500 = vsyncpa [#allocation4], 1 }
 0x338   :  { %502 = vsyncpa [#allocation4 + $0x1], 1 }

</bundles_post_ra>
